<compile_context>
chip_gen: v6e
topology: v6e:2x2x1
jax: 0.10.0
libtpu: 0.0.40
codegen_flags: <defaults>
</compile_context>

<pallas_src>
import jax
import jax.numpy as jnp
from jax.experimental import pallas as pl
from jax.experimental.pallas import tpu as pltpu

_LANES = 128
_MiB = 1024 * 1024
_FAST_PATH_BYTES = 1 * _MiB  # below this, fused XLA elementwise wins


def _simple_kernel(x_ref, o_ref):
    # Elementwise hot path on the VPU; weak-typed constants keep the compute
    # in the input dtype, explicit cast guards the store dtype.
    o_ref[...] = (x_ref[...] * 0.5 + 1.0).astype(o_ref.dtype)


def _round_up(n: int, m: int) -> int:
    return ((n + m - 1) // m) * m


def _sublanes_for(itemsize: int) -> int:
    # Full vreg packing: f32 -> 8 sublanes, bf16/f16 -> 16, int8/fp8 -> 32.
    if itemsize >= 4:
        return 8
    return 8 * (4 // itemsize)


def _device_caps():
    """Returns (target_block_bytes, vmem_limit_bytes_or_None, multicore_tc)."""
    try:
        kind = jax.devices()[0].device_kind.lower()
    except Exception:
        kind = ""
    if "v7" in kind:
        # 64 MiB physical VMEM, 2 TensorCores per chip.
        return 6 * _MiB, 48 * _MiB, True
    if "v6" in kind:
        # 128 MiB physical VMEM, 1 TensorCore.
        return 8 * _MiB, 64 * _MiB, False
    if "v5e" in kind or "v5 lite" in kind or "v5lite" in kind:
        # 16 MiB default scoped VMEM (128 MiB physical), 1 TensorCore.
        return 4 * _MiB, 64 * _MiB, False
    if "v5" in kind or "v4" in kind:
        # v5p / v4 megacore: 2 TensorCores.
        return 8 * _MiB, 64 * _MiB, True
    # Unknown device: stay under every default scoped limit, no override.
    return 2 * _MiB, None, False


def _run_tiled(x2: jax.Array, dtype) -> jax.Array:
    """Tiled lane-dense Pallas call on a (rows, 128) view."""
    rows, lanes = x2.shape
    itemsize = jnp.dtype(dtype).itemsize
    sublanes = _sublanes_for(itemsize)
    target_block_bytes, vmem_limit, multicore = _device_caps()

    # Rows per block: ~target_block_bytes, rounded to full-packed vregs.
    max_rows = max(
        sublanes,
        (target_block_bytes // (lanes * itemsize)) // sublanes * sublanes,
    )
    tile_rows = min(rows, max_rows)  # if == rows, full-extent block (always legal)
    grid = pl.cdiv(rows, tile_rows)

    # Only devices with 2 TensorCores benefit from grid balancing; single-TC
    # chips would just pay an extra ~0.35 us grid-step boundary.
    if multicore:
        if grid == 1 and rows > sublanes:
            tile_rows = max(sublanes, _round_up(pl.cdiv(rows, 2), sublanes))
            grid = pl.cdiv(rows, tile_rows)
        elif 1 < grid < 8 and grid % 2 == 1:
            cand = max(sublanes, _round_up(pl.cdiv(rows, grid + 1), sublanes))
            if cand < rows and pl.cdiv(rows, cand) % 2 == 0:
                tile_rows = cand
                grid = pl.cdiv(rows, cand)

    compiler_kwargs = dict(dimension_semantics=("parallel",))
    if vmem_limit is not None:
        compiler_kwargs["vmem_limit_bytes"] = vmem_limit

    return pl.pallas_call(
        _simple_kernel,
        out_shape=jax.ShapeDtypeStruct((rows, lanes), dtype),
        grid=(grid,),
        in_specs=[pl.BlockSpec((tile_rows, lanes), lambda i: (i, 0))],
        out_specs=pl.BlockSpec((tile_rows, lanes), lambda i: (i, 0)),
        compiler_params=pltpu.CompilerParams(**compiler_kwargs),
    )(x2)


def simple_forward(x: jax.Array, *, force_pallas: bool = False) -> jax.Array:
    """Computes x * 0.5 + 1.0 with a lane-dense Pallas TPU kernel."""
    orig_shape = x.shape
    dtype = x.dtype
    total = int(x.size)
    itemsize = jnp.dtype(dtype).itemsize

    # Degenerate / tiny inputs: XLA's fused elementwise beats any kernel launch.
    if total == 0 or (not force_pallas and total * itemsize < _FAST_PATH_BYTES):
        return (x * 0.5 + 1.0).astype(dtype)

    if total % _LANES == 0:
        # Zero-copy lane-dense view: no padding, no extra HBM passes.
        rows = total // _LANES
        out2 = _run_tiled(x.reshape(rows, _LANES), dtype)
        return out2.reshape(orig_shape)

    # Unaligned element count: Pallas on the 128-aligned prefix, XLA on the
    # tiny (<128 element) tail. No full-tensor pad/slice round trips.
    aligned = (total // _LANES) * _LANES
    flat = x.reshape(-1)
    if aligned == 0:
        return (x * 0.5 + 1.0).astype(dtype)
    head = flat[:aligned].reshape(aligned // _LANES, _LANES)
    out_head = _run_tiled(head, dtype).reshape(-1)
    out_tail = (flat[aligned:] * 0.5 + 1.0).astype(dtype)
    return jnp.concatenate([out_head, out_tail]).reshape(orig_shape)


if __name__ == "__main__":
    key = jax.random.PRNGKey(0)

    # Small NCHW-style input matching the module's expected usage.
    x = jax.random.normal(key, (2, 4, 16, 16), dtype=jnp.float32)

    # Force the Pallas path so the kernel itself is exercised and verified
    # (the default fast path would hand this tiny input to plain XLA).
    out = jax.block_until_ready(simple_forward(x, force_pallas=True))
    ref = x * 0.5 + 1.0
    assert out.shape == x.shape
    assert out.dtype == x.dtype
    assert jnp.allclose(out, ref, atol=1e-6, rtol=1e-6)

    # Unaligned total (not a multiple of 128): Pallas prefix + XLA tail path.
    x_odd = jax.random.normal(jax.random.PRNGKey(1), (3, 5, 67), dtype=jnp.float32)
    out_odd = jax.block_until_ready(simple_forward(x_odd, force_pallas=True))
    assert out_odd.shape == x_odd.shape
    assert jnp.allclose(out_odd, x_odd * 0.5 + 1.0, atol=1e-6, rtol=1e-6)

    # bf16 path exercises dtype-aware (16-row) sublane packing.
    x_bf = jax.random.normal(jax.random.PRNGKey(2), (4, 256, 128), dtype=jnp.bfloat16)
    out_bf = jax.block_until_ready(simple_forward(x_bf, force_pallas=True))
    ref_bf = x_bf * 0.5 + 1.0
    assert out_bf.dtype == jnp.bfloat16
    assert jnp.allclose(out_bf.astype(jnp.float32), ref_bf.astype(jnp.float32),
                        atol=2e-2, rtol=2e-2)

    # Default dispatch (tiny input -> fused XLA fast path).
    out_fast = jax.block_until_ready(simple_forward(x))
    assert jnp.allclose(out_fast, ref, atol=1e-6, rtol=1e-6)

    print("KERNEL_OK")
</pallas_src>

<mosaic_0001>
module attributes {stable_mosaic.version = 11 : i64} {
  func.func @_simple_kernel(%arg0: i32, %arg1: memref<16x128xf32, #tpu.memory_space<vmem>>, %arg2: memref<16x128xf32, #tpu.memory_space<vmem>>) attributes {dimension_semantics = [#tpu.dimension_semantics<parallel>], iteration_bounds = array<i64: 1>, scalar_prefetch = 0 : i64, scratch_operands = 0 : i64, tpu.core_type = #tpu.core_type<tc>, window_params = [{transform_indices = @transform_0, window_bounds = array<i64: 16, 128>}, {transform_indices = @transform_1, window_bounds = array<i64: 16, 128>}]} {
    %c0 = arith.constant 0 : index
    %c0_0 = arith.constant 0 : index
    %0 = vector.load %arg1[%c0, %c0_0] : memref<16x128xf32, #tpu.memory_space<vmem>>, vector<16x128xf32>
    %cst = arith.constant 5.000000e-01 : f32
    %1 = vector.broadcast %cst : f32 to vector<16x128xf32>
    %2 = arith.mulf %0, %1 : vector<16x128xf32>
    %cst_1 = arith.constant 1.000000e+00 : f32
    %3 = vector.broadcast %cst_1 : f32 to vector<16x128xf32>
    %4 = arith.addf %2, %3 : vector<16x128xf32>
    %c0_2 = arith.constant 0 : index
    %c0_3 = arith.constant 0 : index
    %5 = vector.load %arg2[%c0_2, %c0_3] : memref<16x128xf32, #tpu.memory_space<vmem>>, vector<16x128xf32>
    tpu.vector_store %arg2[%c0_2, %c0_3], %4 {strides = array<i32>} : memref<16x128xf32, #tpu.memory_space<vmem>>, vector<16x128xf32>,
    return
  }
  func.func @transform_0(%arg0: i32) -> (i32, i32) {
    %c0_i32 = arith.constant 0 : i32
    %c0_i32_0 = arith.constant 0 : i32
    return %arg0, %c0_i32 : i32, i32
  }
  func.func @transform_1(%arg0: i32) -> (i32, i32) {
    %c0_i32 = arith.constant 0 : i32
    %c0_i32_0 = arith.constant 0 : i32
    return %arg0, %c0_i32 : i32, i32
  }
}

</mosaic_0001>

<bundles_post_ra>
// kernel: tpu_custom_call.1
= control target key start
LH: loop header
LB: loop body
LE: loop exit
PB: predicated region body
PF: predicated region fallthrough
CT: control target
= control target key end

     0   :  { %6 = vsyncpa [#allocation3], 0  ;;  %s116_s0 = inlined_call_operand.hbm [shape: f32[16,128], index: 0, kind: input, shape index: {}]   ;;  %s117_s1 = inlined_call_operand.hbm [shape: f32[16,128], index: 1, kind: output, shape index: {}]  }
   0x1   :  { %7 = vsyncpa [#allocation4], 0  ;;  %s96_s6 = smov [#allocation2]  }
   0x2   :  { %s13_s7 = sshll.u32 %s96_s6, 4  ;;  %s14_s7 = int_to_ptr.vmem [resolvable:$true] %s13_s7 }
   0x3   :  { %s60_s8 = scalar_lea.vmem %s14_s7, 256  ;;  %p65_p1 = scmp.lt.s32.totalorder %s14_s7, %s14_s7 }
   0x4   :  { %p61_p0 = scmp.ne.s32.totalorder %s14_s7, %s60_s8  ;;  %p66_p2 = scmp.lt.s32.totalorder %s60_s8, %s60_s8 }
   0x6   :  { %p67_p3 = por %p66_p2, %p65_p1 }
   0x8   :  { %p68_p4 = pnand %p67_p3, %p61_p0 }
   0xa   :  { %71 = shalt.err (!%p68_p4)
}
   0xb   :  { %s97_s9 = smov 128   ;;  %s98_s10 = smov 8  }
   0xc   :  { %19 = dma.hbm_to_vmem [thread:$0]  %s116_s0, 256, %s14_s7, [#allocation3], %s97_s9, %s97_s9, %s98_s10  }
   0xd   :  { %92 = dma.done.wait [#allocation3], 256  }
   0xe   :  { %93 = vsyncadd [#allocation3], 4294967040  ;;  %v23_v0 = vld [vmem:[#allocation2] sm:$0xff]  ;;  %v24_v1 = vld [vmem:[#allocation2 + $0x8] sm:$0xff]  ;;  %s99_s13 = smov [#allocation5]  }
   0xf   :  { %s36_s14 = sshll.u32 %s99_s13, 4  ;;  %v25_v2 = vmul.f32 0.5, %v23_v0  ;;  %v26_v3 = vmul.f32 0.5, %v24_v1  ;;  %s37_s14 = int_to_ptr.vmem [resolvable:$true] %s36_s14 }
  0x10   :  { %s72_s15 = scalar_lea.vmem %s37_s14, 256  ;;  %p77_p6 = scmp.lt.s32.totalorder %s37_s14, %s37_s14 }
  0x11   :  { %v27_v4 = vadd.f32 1.0, %v25_v2  ;;  %v28_v5 = vadd.f32 1.0, %v26_v3  ;;  %p73_p5 = scmp.ne.s32.totalorder %s37_s14, %s72_s15  ;;  %p78_p7 = scmp.lt.s32.totalorder %s72_s15, %s72_s15 }
  0x13   :  { %29 = vst [vmem:[#allocation5] sm:$0xff] %v27_v4  ;;  %30 = vst [vmem:[#allocation5 + $0x8] sm:$0xff] %v28_v5  ;;  %p79_p8 = por %p78_p7, %p77_p6 }
  0x15   :  { %p80_p9 = pnand %p79_p8, %p73_p5 }
  0x17   :  { %83 = shalt.err (!%p80_p9)
}
  0x18   :  { %42 = dma.vmem_to_hbm [thread:$0]  %s37_s14, 256, %s117_s1, [#allocation4], %s97_s9, %s97_s9, %s98_s10  }
  0x19   :  { %94 = dma.done.wait [#allocation4], 256  }
  0x1a   :  { %95 = vsyncadd [#allocation4], 4294967040 }
  0x1b   :  { %46 = vsyncpa [#allocation3], 1 }
  0x1c   :  { %47 = vsyncpa [#allocation4], 1 }

</bundles_post_ra>
